<compile_context>
chip_gen: v7x
topology: tpu7x:2x2x1
jax: 0.10.0
libtpu: 0.0.40
codegen_flags: <defaults>
</compile_context>

<pallas_src>
import functools

import jax
import jax.numpy as jnp
from jax.experimental import pallas as pl
from jax.experimental.pallas import tpu as pltpu


IN_DIM = 784
H1_DIM = 128
H2_DIM = 64
OUT_DIM = 10

H2_PAD = 128    # lane-dense hidden-2
OUT_PAD = 128   # lane-dense output slab


def _round_up(n, m):
    return ((n + m - 1) // m) * m


def mlp_kernel(x_ref, w1_ref, b1_ref, w2_ref, b2_ref, w3_ref, b3_ref, o_ref):
    # In-kernel bf16 cast of the streamed f32 x tile (free under DMA-bound regime).
    x = x_ref[...].astype(jnp.bfloat16)

    # Layer 1: (TM, 784) bf16 @ (784, 128) bf16 -> f32 acc, bias+ReLU in f32.
    h1 = jnp.dot(x, w1_ref[...], preferred_element_type=jnp.float32)
    h1 = jnp.maximum(h1 + b1_ref[...], 0.0)

    # Layer 2: (TM, 128) @ (128, 128-padded) -> f32 acc.
    h2 = jnp.dot(h1.astype(jnp.bfloat16), w2_ref[...],
                 preferred_element_type=jnp.float32)
    h2 = jnp.maximum(h2 + b2_ref[...], 0.0)

    # Layer 3: (TM, 128) @ (128, 128-padded) -> f32, lane-dense bf16 store.
    out = jnp.dot(h2.astype(jnp.bfloat16), w3_ref[...],
                  preferred_element_type=jnp.float32)
    o_ref[...] = (out + b3_ref[...]).astype(o_ref.dtype)


def prepare_params(params):
    """One-time layout plumbing: pad to lane-dense shapes and cast weights to bf16.

    Input params: (w1, b1, w2, b2, w3, b3) with W as (in_features, out_features)
    and b as (1, out_features), all f32.
    """
    w1, b1, w2, b2, w3, b3 = params
    w1p = w1.astype(jnp.bfloat16)                                        # (784, 128)
    b1p = b1.astype(jnp.float32)                                         # (1, 128)
    w2p = jnp.pad(w2, ((0, 0), (0, H2_PAD - H2_DIM))).astype(jnp.bfloat16)   # (128, 128)
    b2p = jnp.pad(b2, ((0, 0), (0, H2_PAD - H2_DIM))).astype(jnp.float32)    # (1, 128)
    w3p = jnp.pad(w3, ((0, H2_PAD - H2_DIM), (0, OUT_PAD - OUT_DIM))
                  ).astype(jnp.bfloat16)                                 # (128, 128)
    b3p = jnp.pad(b3, ((0, 0), (0, OUT_PAD - OUT_DIM))).astype(jnp.float32)  # (1, 128)
    return (w1p, b1p, w2p, b2p, w3p, b3p)


def _choose_tiling(batch, tm):
    """Pick (tm_eff, n_tiles): even grid >= 2 when the batch allows it (v7x megacore)."""
    if batch <= 8:
        n_tiles = 1
    else:
        n_tiles = max(2, pl.cdiv(batch, tm))
        if n_tiles % 2:
            n_tiles += 1
    tm_eff = _round_up(pl.cdiv(batch, n_tiles), 8)
    return tm_eff, n_tiles


@functools.partial(jax.jit, static_argnames=("tm",))
def simplenet_forward(x, prepped_params, *, tm=1024):
    """x: (B, 784) f32. prepped_params: output of prepare_params()."""
    w1p, b1p, w2p, b2p, w3p, b3p = prepped_params
    B = x.shape[0]

    tm_eff, n_tiles = _choose_tiling(B, tm)
    Bp = tm_eff * n_tiles

    # Batch pad only when needed (skip the extra x-sized HBM pass when aligned).
    xp = x if Bp == B else jnp.pad(x, ((0, Bp - B), (0, 0)))

    grid = (n_tiles,)

    # Streamed tiles (indexed by grid) for x / out; constant index_maps keep the
    # weights & biases resident in VMEM across every grid step.
    x_spec = pl.BlockSpec((tm_eff, IN_DIM), lambda i: (i, 0))
    o_spec = pl.BlockSpec((tm_eff, OUT_PAD), lambda i: (i, 0))
    res = lambda a: pl.BlockSpec(a.shape, lambda i: (0, 0))

    flops = 2 * Bp * (IN_DIM * H1_DIM + H1_DIM * H2_PAD + H2_PAD * OUT_PAD)
    bytes_accessed = (
        Bp * IN_DIM * 4                                                     # x (f32)
        + (IN_DIM * H1_DIM + H1_DIM * H2_PAD + H2_PAD * OUT_PAD) * 2        # weights (bf16)
        + (H1_DIM + H2_PAD + OUT_PAD) * 4                                   # biases (f32)
        + Bp * OUT_PAD * 2                                                  # output (bf16)
    )

    out = pl.pallas_call(
        mlp_kernel,
        out_shape=jax.ShapeDtypeStruct((Bp, OUT_PAD), jnp.bfloat16),
        grid_spec=pltpu.PrefetchScalarGridSpec(
            num_scalar_prefetch=0,
            grid=grid,
            in_specs=[x_spec, res(w1p), res(b1p), res(w2p), res(b2p),
                      res(w3p), res(b3p)],
            out_specs=o_spec,
        ),
        compiler_params=pltpu.CompilerParams(
            dimension_semantics=("parallel",),
            vmem_limit_bytes=32 * 1024 * 1024,
        ),
        cost_estimate=pl.CostEstimate(
            flops=flops, transcendentals=0, bytes_accessed=bytes_accessed),
    )(xp, w1p, b1p, w2p, b2p, w3p, b3p)

    # Slice away batch padding / padded logit lanes; return f32 logits.
    return out[:B, :OUT_DIM].astype(jnp.float32)


def init_params(key):
    """Deterministic init mirroring torch.nn.Linear default (U[-1/sqrt(fan_in), +]).
    Weights are stored as (in_features, out_features)."""
    dims = [(IN_DIM, H1_DIM), (H1_DIM, H2_DIM), (H2_DIM, OUT_DIM)]
    params = []
    for (fan_in, fan_out) in dims:
        key, kw, kb = jax.random.split(key, 3)
        bound = 1.0 / (fan_in ** 0.5)
        w = jax.random.uniform(kw, (fan_in, fan_out), jnp.float32, -bound, bound)
        b = jax.random.uniform(kb, (1, fan_out), jnp.float32, -bound, bound)
        params += [w, b]
    return tuple(params)


def reference_forward(x, params):
    w1, b1, w2, b2, w3, b3 = params
    h1 = jnp.maximum(x @ w1 + b1, 0.0)
    h2 = jnp.maximum(h1 @ w2 + b2, 0.0)
    return h2 @ w3 + b3


if __name__ == "__main__":
    key = jax.random.PRNGKey(0)
    key, kx = jax.random.split(key)

    # Small batch; the tiling heuristic still yields a 2-step (even) grid.
    B = 64
    x = jax.random.normal(kx, (B, IN_DIM), jnp.float32)

    params = init_params(key)
    prepped = prepare_params(params)

    out = simplenet_forward(x, prepped)
    out = jax.block_until_ready(out)

    ref = reference_forward(x, params)
    assert out.shape == (B, OUT_DIM)
    # bf16 weights/activations with f32 accumulation and bf16 output slab:
    # compare with a relative-to-scale error bound, not tight f32 allclose.
    err = float(jnp.max(jnp.abs(out - ref)) / (jnp.max(jnp.abs(ref)) + 1e-6))
    assert err < 2e-2, f"max relative-to-scale error too large: {err}"

    print("KERNEL_OK")
</pallas_src>

<mosaic_0001>
module attributes {stable_mosaic.version = 11 : i64} {
  func.func @mlp_kernel(%arg0: i32, %arg1: memref<32x784xf32, #tpu.memory_space<vmem>>, %arg2: memref<784x128xbf16, #tpu.memory_space<vmem>>, %arg3: memref<1x128xf32, #tpu.memory_space<vmem>>, %arg4: memref<128x128xbf16, #tpu.memory_space<vmem>>, %arg5: memref<1x128xf32, #tpu.memory_space<vmem>>, %arg6: memref<128x128xbf16, #tpu.memory_space<vmem>>, %arg7: memref<1x128xf32, #tpu.memory_space<vmem>>, %arg8: memref<32x128xbf16, #tpu.memory_space<vmem>>) attributes {dimension_semantics = [#tpu.dimension_semantics<parallel>], iteration_bounds = array<i64: 2>, scalar_prefetch = 0 : i64, scratch_operands = 0 : i64, tpu.core_type = #tpu.core_type<tc>, window_params = [{transform_indices = @transform_0, window_bounds = array<i64: 32, 784>}, {pipeline_mode = #tpu.pipeline_mode<synchronous>, transform_indices = @transform_1, window_bounds = array<i64: 784, 128>}, {pipeline_mode = #tpu.pipeline_mode<synchronous>, transform_indices = @transform_2, window_bounds = array<i64: 1, 128>}, {pipeline_mode = #tpu.pipeline_mode<synchronous>, transform_indices = @transform_3, window_bounds = array<i64: 128, 128>}, {pipeline_mode = #tpu.pipeline_mode<synchronous>, transform_indices = @transform_4, window_bounds = array<i64: 1, 128>}, {pipeline_mode = #tpu.pipeline_mode<synchronous>, transform_indices = @transform_5, window_bounds = array<i64: 128, 128>}, {pipeline_mode = #tpu.pipeline_mode<synchronous>, transform_indices = @transform_6, window_bounds = array<i64: 1, 128>}, {transform_indices = @transform_7, window_bounds = array<i64: 32, 128>}]} {
    %c0 = arith.constant 0 : index
    %c0_0 = arith.constant 0 : index
    %0 = vector.load %arg1[%c0, %c0_0] : memref<32x784xf32, #tpu.memory_space<vmem>>, vector<32x784xf32>
    %1 = arith.truncf %0 : vector<32x784xf32> to vector<32x784xbf16>
    %c0_1 = arith.constant 0 : index
    %c0_2 = arith.constant 0 : index
    %2 = vector.load %arg2[%c0_1, %c0_2] : memref<784x128xbf16, #tpu.memory_space<vmem>>, vector<784x128xbf16>
    %cst = arith.constant dense<0.000000e+00> : vector<32x128xf32>
    %3 = tpu.matmul %1, %2, %cst {dimension_numbers = #tpu.dot_dimension_numbers<[1], [0], [0], [1], [0, 0, 1, 1], [], []>} : vector<32x784xbf16>, vector<784x128xbf16>, vector<32x128xf32> -> vector<32x128xf32>
    %c0_3 = arith.constant 0 : index
    %c0_4 = arith.constant 0 : index
    %4 = vector.load %arg3[%c0_3, %c0_4] : memref<1x128xf32, #tpu.memory_space<vmem>>, vector<1x128xf32>
    %5 = vector.broadcast %4 : vector<1x128xf32> to vector<32x128xf32>
    %6 = arith.addf %3, %5 : vector<32x128xf32>
    %cst_5 = arith.constant 0.000000e+00 : f32
    %7 = vector.broadcast %cst_5 : f32 to vector<32x128xf32>
    %8 = arith.maximumf %6, %7 : vector<32x128xf32>
    %9 = arith.truncf %8 : vector<32x128xf32> to vector<32x128xbf16>
    %c0_6 = arith.constant 0 : index
    %c0_7 = arith.constant 0 : index
    %10 = vector.load %arg4[%c0_6, %c0_7] : memref<128x128xbf16, #tpu.memory_space<vmem>>, vector<128x128xbf16>
    %cst_8 = arith.constant dense<0.000000e+00> : vector<32x128xf32>
    %11 = tpu.matmul %9, %10, %cst_8 {dimension_numbers = #tpu.dot_dimension_numbers<[1], [0], [0], [1], [0, 0, 1, 1], [], []>} : vector<32x128xbf16>, vector<128x128xbf16>, vector<32x128xf32> -> vector<32x128xf32>
    %c0_9 = arith.constant 0 : index
    %c0_10 = arith.constant 0 : index
    %12 = vector.load %arg5[%c0_9, %c0_10] : memref<1x128xf32, #tpu.memory_space<vmem>>, vector<1x128xf32>
    %13 = vector.broadcast %12 : vector<1x128xf32> to vector<32x128xf32>
    %14 = arith.addf %11, %13 : vector<32x128xf32>
    %cst_11 = arith.constant 0.000000e+00 : f32
    %15 = vector.broadcast %cst_11 : f32 to vector<32x128xf32>
    %16 = arith.maximumf %14, %15 : vector<32x128xf32>
    %17 = arith.truncf %16 : vector<32x128xf32> to vector<32x128xbf16>
    %c0_12 = arith.constant 0 : index
    %c0_13 = arith.constant 0 : index
    %18 = vector.load %arg6[%c0_12, %c0_13] : memref<128x128xbf16, #tpu.memory_space<vmem>>, vector<128x128xbf16>
    %cst_14 = arith.constant dense<0.000000e+00> : vector<32x128xf32>
    %19 = tpu.matmul %17, %18, %cst_14 {dimension_numbers = #tpu.dot_dimension_numbers<[1], [0], [0], [1], [0, 0, 1, 1], [], []>} : vector<32x128xbf16>, vector<128x128xbf16>, vector<32x128xf32> -> vector<32x128xf32>
    %c0_15 = arith.constant 0 : index
    %c0_16 = arith.constant 0 : index
    %20 = vector.load %arg7[%c0_15, %c0_16] : memref<1x128xf32, #tpu.memory_space<vmem>>, vector<1x128xf32>
    %21 = vector.broadcast %20 : vector<1x128xf32> to vector<32x128xf32>
    %22 = arith.addf %19, %21 : vector<32x128xf32>
    %23 = arith.truncf %22 : vector<32x128xf32> to vector<32x128xbf16>
    %c0_17 = arith.constant 0 : index
    %c0_18 = arith.constant 0 : index
    %24 = vector.load %arg8[%c0_17, %c0_18] : memref<32x128xbf16, #tpu.memory_space<vmem>>, vector<32x128xbf16>
    tpu.vector_store %arg8[%c0_17, %c0_18], %23 {strides = array<i32>} : memref<32x128xbf16, #tpu.memory_space<vmem>>, vector<32x128xbf16>,
    return
  }
  func.func @transform_0(%arg0: i32) -> (i32, i32) {
    %c0_i32 = arith.constant 0 : i32
    %c0_i32_0 = arith.constant 0 : i32
    return %arg0, %c0_i32 : i32, i32
  }
  func.func @transform_1(%arg0: i32) -> (i32, i32) {
    %c0_i32 = arith.constant 0 : i32
    %c0_i32_0 = arith.constant 0 : i32
    %c0_i32_1 = arith.constant 0 : i32
    return %c0_i32, %c0_i32_0 : i32, i32
  }
  func.func @transform_2(%arg0: i32) -> (i32, i32) {
    %c0_i32 = arith.constant 0 : i32
    %c0_i32_0 = arith.constant 0 : i32
    %c0_i32_1 = arith.constant 0 : i32
    return %c0_i32, %c0_i32_0 : i32, i32
  }
  func.func @transform_3(%arg0: i32) -> (i32, i32) {
    %c0_i32 = arith.constant 0 : i32
    %c0_i32_0 = arith.constant 0 : i32
    %c0_i32_1 = arith.constant 0 : i32
    return %c0_i32, %c0_i32_0 : i32, i32
  }
  func.func @transform_4(%arg0: i32) -> (i32, i32) {
    %c0_i32 = arith.constant 0 : i32
    %c0_i32_0 = arith.constant 0 : i32
    %c0_i32_1 = arith.constant 0 : i32
    return %c0_i32, %c0_i32_0 : i32, i32
  }
  func.func @transform_5(%arg0: i32) -> (i32, i32) {
    %c0_i32 = arith.constant 0 : i32
    %c0_i32_0 = arith.constant 0 : i32
    %c0_i32_1 = arith.constant 0 : i32
    return %c0_i32, %c0_i32_0 : i32, i32
  }
  func.func @transform_6(%arg0: i32) -> (i32, i32) {
    %c0_i32 = arith.constant 0 : i32
    %c0_i32_0 = arith.constant 0 : i32
    %c0_i32_1 = arith.constant 0 : i32
    return %c0_i32, %c0_i32_0 : i32, i32
  }
  func.func @transform_7(%arg0: i32) -> (i32, i32) {
    %c0_i32 = arith.constant 0 : i32
    %c0_i32_0 = arith.constant 0 : i32
    return %arg0, %c0_i32 : i32, i32
  }
}

</mosaic_0001>

<bundles_post_ra>
// kernel: simplenet_forward.1
= control target key start
LH: loop header
LB: loop body
LE: loop exit
PB: predicated region body
PF: predicated region fallthrough
CT: control target
= control target key end

     0   :  { %12 = vsyncpa [#allocation3], 0  ;;  %s2225_s0 = inlined_call_operand.hbm [shape: f32[64,784], index: 0, kind: input, shape index: {}]   ;;  %s2226_s1 = inlined_call_operand.hbm [shape: bf16[784,128], index: 1, kind: input, shape index: {}]   ;;  %s2227_s2 = inlined_call_operand.vmem [shape: f32[1,128], index: 2, kind: input, shape index: {}]   ;;  %s2228_s3 = inlined_call_operand.hbm [shape: bf16[128,128], index: 3, kind: input, shape index: {}]   ;;  %s2229_s4 = inlined_call_operand.vmem [shape: f32[1,128], index: 4, kind: input, shape index: {}]   ;;  %s2230_s5 = inlined_call_operand.hbm [shape: bf16[128,128], index: 5, kind: input, shape index: {}]   ;;  %s2231_s6 = inlined_call_operand.vmem [shape: f32[1,128], index: 6, kind: input, shape index: {}]   ;;  %s2232_s7 = inlined_call_operand.vmem [shape: bf16[64,128], index: 7, kind: output, shape index: {}]  }
   0x1   :  { %14 = vsyncpa [#allocation3 + $0x1], 0 }
   0x2   :  { %15 = vsyncpa [#allocation5], 0 }
   0x3   :  { %16 = vsyncpa [#allocation8], 0  ;;  %s1967_s24 = smov 0   ;;  %s1969_s25 = smov 0  }
   0x4   :  { %s1971_s26 = smov 0   ;;  %s1973_s27 = smov 0  }
   0x5 LB: > { %s1359_s28 = sadd.s32 4294967295, %s1917_s27   ;;  %p42_p0 = scmp.ne.s32.totalorder %s1909_s25, %s1905_s24  ;;  %s1917_s27 = sphi %s1973_s27, %s2249_s27   ;;  %s1913_s26 = sphi %s1971_s26, %s2248_s26   ;;  %s1909_s25 = sphi %s1969_s25, %s2247_s25   ;;  %s1905_s24 = sphi %s1967_s24, %s2246_s24  }
   0x6   : > { %p1989_p1 = scmp.eq.s32.totalorder %s1359_s28, 0  ;;  %p1361_p2 = scmp.ge.s32.totalorder %s1917_s27, 1 }
   0x7   : > { %p205_p3 = scmp.lt.s32.totalorder %s1917_s27, 3  ;;  %s1919_s9 = smov [#allocation4]  }
   0x8   : > { %s2237_s29 = scalar_select %p1989_p1, 1, 0 }
   0x9   : > { %p1997_p4 = por %p1989_p1, %p42_p0  ;;  %p2001_p5 = pnand %p1361_p2, %p205_p3 }
   0xa   : > { %s217_s10 = sshll.u32 %s1919_s9, 4  ;;  %s1920_s12 = smov [#allocation6]   ;;  %s2005_s10 = int_to_ptr.vmem [resolvable:$true] %s217_s10 }
   0xb   : > { %s2238_s30 = scalar_select %p1997_p4, 1, 0 }
   0xc   : > { %s2239_s8 = scalar_select %p2001_p5, 1, 0 }
   0xd   : > { %p1636_p6 = pneg %p2001_p5  ;;  %s233_s13 = sshll.u32 %s1920_s12, 4  ;;  %s2015_s13 = int_to_ptr.vmem [resolvable:$true] %s233_s13 }
   0xe   : > { %s1921_s14 = smov [#allocation7]   ;;  %s1761_s18 = scalar_lea.hbm %s2226_s1, 6272 }
   0xf   : > { %p2011_p7 = pnand %p1636_p6, %p1989_p1  ;;  %s2017_s15 = sshll.u32 %s1921_s14, 4  ;;  %s250_s15 = int_to_ptr.vmem [resolvable:$true] %s2017_s15 }
  0x10   : > { %p1762_p8 = scmp.ne.s32.totalorder %s2226_s1, %s1761_s18  ;;  %p1768_p12 = scmp.lt.u32.totalorder %s1761_s18, %s2226_s1 }
  0x11   : > { %p2027_p9 = pneg %p2011_p7 }
  0x13   : > { %p1764_p10 = pnand %p2027_p9, %p1762_p8 }
  0x15   : > { %p1765_p11 = pneg %p1764_p10 }
  0x17   : > { %p1770_p13 = pnand %p1768_p12, %p1765_p11 }
  0x19   : > { %1773 = shalt.err (!%p1770_p13)
}
  0x1a   : > { %s1774_s24 = scalar_lea.vmem %s2005_s10, 6272  ;;  %p1782_p6 = scmp.lt.s32.totalorder %s2005_s10, %s2005_s10 }
  0x1b   : > { %p1775_p0 = scmp.ne.s32.totalorder %s2005_s10, %s1774_s24  ;;  %p1783_p1 = scmp.lt.s32.totalorder %s1774_s24, %s1774_s24 }
  0x1d   : > { %p1777_p2 = pnand %p1775_p0, %p2027_p9  ;;  %p1784_p8 = por %p1783_p1, %p1782_p6 }
  0x1f   : > { %p1778_p3 = pneg %p1777_p2 }
  0x21   : > { %p1785_p10 = pnand %p1784_p8, %p1778_p3 }
  0x23   : > { %1788 = shalt.err (!%p1785_p10)
}
  0x24   : > { %s1922_s9 = smov 64   ;;  %s1923_s12 = smov 4  }
  0x25   : > { %1639 = dma.hbm_to_vmem [thread:$0]  (!%p2011_p7), %s2226_s1, 6272, %s2005_s10, [#allocation5], %s1922_s9, %s1922_s9, %s1923_s12  }
  0x26   : > { %s1789_s19 = scalar_lea.hbm %s2228_s3, 1024 }
  0x27   : > { %p1790_p1 = scmp.ne.s32.totalorder %s2228_s3, %s1789_s19  ;;  %p1796_p13 = scmp.lt.u32.totalorder %s1789_s19, %s2228_s3 }
  0x29   : > { %p1792_p11 = pnand %p1790_p1, %p2027_p9 }
  0x2b   : > { %p1793_p12 = pneg %p1792_p11 }
  0x2d   : > { %p1798_p0 = pnand %p1796_p13, %p1793_p12 }
  0x2f   : > { %1801 = shalt.err (!%p1798_p0)
}
  0x30   : > { %s1802_s10 = scalar_lea.vmem %s2015_s13, 1024  ;;  %p1810_p8 = scmp.lt.s32.totalorder %s2015_s13, %s2015_s13 }
  0x31   : > { %p1803_p2 = scmp.ne.s32.totalorder %s2015_s13, %s1802_s10  ;;  %p1811_p10 = scmp.lt.s32.totalorder %s1802_s10, %s1802_s10 }
  0x33   : > { %p1805_p3 = pnand %p1803_p2, %p2027_p9  ;;  %p1812_p1 = por %p1811_p10, %p1810_p8 }
  0x35   : > { %p1806_p6 = pneg %p1805_p3 }
  0x37   : > { %p1813_p11 = pnand %p1812_p1, %p1806_p6 }
  0x39   : > { %1816 = shalt.err (!%p1813_p11)
}
  0x3a   : > { %1642 = dma.hbm_to_vmem [thread:$0]  (!%p2011_p7), %s2228_s3, 1024, %s2015_s13, [#allocation5], %s1922_s9, %s1922_s9, %s1923_s12  }
  0x3b   : > { %s1817_s19 = scalar_lea.hbm %s2230_s5, 1024 }
  0x3c   : > { %p1818_p12 = scmp.ne.s32.totalorder %s2230_s5, %s1817_s19  ;;  %p1824_p2 = scmp.lt.u32.totalorder %s1817_s19, %s2230_s5 }
  0x3e   : > { %p1820_p13 = pnand %p1818_p12, %p2027_p9 }
  0x40   : > { %p1821_p0 = pneg %p1820_p13 }
  0x42   : > { %p1826_p3 = pnand %p1824_p2, %p1821_p0 }
  0x44   : > { %1829 = shalt.err (!%p1826_p3)
}
  0x45   : > { %s1830_s10 = scalar_lea.vmem %s250_s15, 1024  ;;  %p1838_p1 = scmp.lt.s32.totalorder %s250_s15, %s250_s15 }
  0x46   : > { %p1831_p6 = scmp.ne.s32.totalorder %s250_s15, %s1830_s10  ;;  %p1839_p11 = scmp.lt.s32.totalorder %s1830_s10, %s1830_s10 }
  0x48   : > { %p1833_p8 = pnand %p1831_p6, %p2027_p9  ;;  %p1840_p4 = por %p1839_p11, %p1838_p1 }
  0x4a   : > { %p1834_p10 = pneg %p1833_p8 }
  0x4c   : > { %p1841_p5 = pnand %p1840_p4, %p1834_p10 }
  0x4e   : > { %1844 = shalt.err (!%p1841_p5)
}
  0x4f   : > { %1645 = dma.hbm_to_vmem [thread:$0]  (!%p2011_p7), %s2230_s5, 1024, %s250_s15, [#allocation8], %s1922_s9, %s1922_s9, %s1923_s12  }
  0x50   : > { %s2100_s21 = sadd.s32 1, %s1917_s27   ;;  %s29_s16 = sadd.s32 1, %s1913_s26 }
  0x51   : > { %s26_s11 = ssub.s32 %s1917_s27, %s2100_s21  ;;  %p36_p5 = scmp.ne.s32.totalorder %s1913_s26, %s1909_s25 }
  0x52   : > { %p27_p4 = scmp.eq.s32.totalorder %s26_s11, 0  ;;  %p37_p9 = scmp.eq.s32.totalorder %s1917_s27, 0 }
  0x53   : > { %p1653_p12 = scmp.lt.s32.totalorder %s1917_s27, 2  ;;  %s266_s18 = sand.u32 1, %s1913_s26  }
  0x54   : > { %s2110_s17 = scalar_select %p27_p4, %s1913_s26, %s29_s16  }
  0x55   : > { %p38_p13 = por %p37_p9, %p36_p5  ;;  %s1619_s19 = smul.u32 224, %s266_s18 }
  0x56   : > { %s1620_s20 = smul.u32 3584, %s1917_s27  ;;  %s2125_s10 = scalar_lea.sflag [#allocation3], %s266_s18 }
  0x57   : > { %p2114_p0 = pnand %p1653_p12, %p38_p13  ;;  %s270_s23 = scalar_lea.vmem [#allocation2], %s1619_s19 }
  0x58   : > { %s2121_s12 = scalar_lea.hbm %s2225_s0, %s1620_s20  ;;  %s278_s24 = sshll.u32 %s270_s23, 4  ;;  %s2123_s24 = int_to_ptr.vmem [resolvable:$true] %s278_s24 }
  0x59   : > { %s1845_s13 = scalar_lea.hbm %s2121_s12, 3584  ;;  %p1847_p2 = pneg %p2114_p0 }
  0x5a   : > { %p1846_p7 = scmp.ne.s32.totalorder %s2121_s12, %s1845_s13  ;;  %s1850_s16 = scalar_lea.hbm %s2225_s0, 7168 }
  0x5b   : > { %p1851_p8 = scmp.lt.u32.totalorder %s2121_s12, %s2225_s0  ;;  %p1852_p10 = scmp.lt.u32.totalorder %s1850_s16, %s1845_s13 }
  0x5c   : > { %p1848_p3 = pnand %p1847_p2, %p1846_p7  ;;  %p1854_p11 = scmp.lt.u32.totalorder %s1845_s13, %s2121_s12 }
  0x5d   : > { %p1853_p1 = por %p1852_p10, %p1851_p8 }
  0x5e   : > { %p1849_p6 = pneg %p1848_p3 }
  0x5f   : > { %p1855_p4 = por %p1854_p11, %p1853_p1 }
  0x61   : > { %p1856_p5 = pnand %p1855_p4, %p1849_p6 }
  0x63   : > { %1859 = shalt.err (!%p1856_p5)
}
  0x64   : > { %s1860_s18 = scalar_lea.vmem %s2123_s24, 3584  ;;  %s1924_s19 = smov [#allocation2]  }
  0x65   : > { %p1861_p9 = scmp.ne.s32.totalorder %s2123_s24, %s1860_s18  ;;  %s1865_s9 = sshll.u32 %s1924_s19, 4  ;;  %s1866_s9 = int_to_ptr.vmem [resolvable:$false] %s1865_s9 }
  0x66   : > { %s1867_s23 = scalar_lea.vmem %s1866_s9, 7168  ;;  %p1868_p7 = scmp.lt.s32.totalorder %s2123_s24, %s1866_s9 }
  0x67   : > { %p1863_p12 = pnand %p1861_p9, %p1847_p2  ;;  %p1869_p3 = scmp.lt.s32.totalorder %s1867_s23, %s1860_s18 }
  0x69   : > { %p1864_p13 = pneg %p1863_p12  ;;  %p1870_p8 = por %p1869_p3, %p1868_p7 }
  0x6b   : > { %p1871_p10 = pnand %p1870_p8, %p1864_p13 }
  0x6d   : > { %1874 = shalt.err (!%p1871_p10)
}
  0x6e   : > { %s1925_s13 = smov 896   ;;  %s1926_s14 = smov 56  }
  0x6f   : > { %1649 = dma.hbm_to_vmem [thread:$0]  (!%p2114_p0), %s2121_s12, 3584, %s2123_s24, %s2125_s10, %s1925_s13, %s1925_s13, %s1926_s14  }
  0x70   : > { %p2243_p2 = scmp.ne.s32.totalorder %s2239_s8, 0 }
  0x71   : > { %s292_s11 = sand.u32 (!%p2243_p2), 1, %s1909_s25   ;;  %p2244_p6 = scmp.ne.s32.totalorder (!%p2243_p2), %s2238_s30, 0 }
  0x72   : > { %290 = sbr.rel (%p2243_p2) target bundleno = 867 (0x363), region = 48  ;;  %s293_s20 = scalar_lea.sflag (!%p2243_p2), [#allocation3], %s292_s11 }
  0x73   : > { %s1621_s16 = smul.u32 (!%p2243_p2), 224, %s292_s11 }
  0x75   : > { %s2156_s15 = scalar_lea.vmem (!%p2243_p2), [#allocation2], %s1621_s16 }
  0x79   : > { %1892 = dma.done.wait (%p2244_p6), %s293_s20, 3584  }
  0x7a   : > { %1894 = vsyncadd (%p2244_p6), %s293_s20, 4294963712  ;;  %p2245_p1 = scmp.ne.s32.totalorder %s2237_s29, 0 }
  0x7c   : > { %1896 = dma.done.wait (%p2245_p1), [#allocation5], 7296  }
  0x7d   : > { %1898 = vsyncadd (%p2245_p1), [#allocation5], 4294960000 }
  0x7e   : > { %1900 = dma.done.wait (%p2245_p1), [#allocation8], 1024  }
  0x7f   : > { %1902 = vsyncadd (%p2245_p1), [#allocation8], 4294966272  ;;  %v1696_v0 = vld [vmem:[#allocation4 + $0x40] sm:$0xff]   ;;  %v1700_v4 = vld [vmem:[#allocation4 + $0x48] sm:$0xff]   ;;  %vm788_vm0 = vcmask 130048   ;;  %s1373_s12 = sshll.u32 %s1359_s28, 2 }
  0x80   : > { %v1697_v1 = vld [vmem:[#allocation4] sm:$0xff]   ;;  %1466 = vmatprep.subr.bf16.mxu0 %v1696_v0  ;;  %v1701_v5 = vld [vmem:[#allocation4 + $0x8] sm:$0xff]   ;;  %v1704_v8 = vld [vmem:[#allocation4 + $0x50] sm:$0xff]   ;;  %p341_p0 = scmp.lt.s32.totalorder %s1373_s12, 7 }
  0x81   : > { %v1698_v2 = vld [vmem:[#allocation4 + $0xc0] sm:$0xff]   ;;  %1467 = vmatpush3.bf16.msra.mxu0 %v1697_v1  ;;  %v1702_v6 = vld [vmem:[#allocation4 + $0xc8] sm:$0xff]   ;;  %v1705_v9 = vld [vmem:[#allocation4 + $0x10] sm:$0xff]  }
  0x82   : > { %v1699_v3 = vld [vmem:[#allocation4 + $0x80] sm:$0xff]   ;;  %1494 = vmatprep.subr.bf16.mxu1 %v1698_v2  ;;  %1468 = vmatprep.subr.bf16.mxu0 %v1700_v4  ;;  %v1703_v7 = vld [vmem:[#allocation4 + $0x88] sm:$0xff]   ;;  %v1706_v10 = vld [vmem:[#allocation4 + $0xd0] sm:$0xff]   ;;  %s2251_s12 = smov (!%p341_p0, %s1373_s12), 7 }
  0x83   : > { %1495 = vmatpush3.bf16.msra.mxu1 %v1699_v3  ;;  %v1707_v11 = vld [vmem:[#allocation4 + $0x90] sm:$0xff]   ;;  %v1708_v12 = vld [vmem:[#allocation4 + $0x58] sm:$0xff]   ;;  %v1712_v16 = vld [vmem:[#allocation4 + $0x60] sm:$0xff]   ;;  %s1374_s18 = sshll.u32 %s2251_s12, 2 }
  0x84   : > { %1496 = vmatprep.subr.bf16.mxu1 %v1702_v6  ;;  %v1709_v13 = vld [vmem:[#allocation4 + $0x18] sm:$0xff]   ;;  %v1713_v17 = vld [vmem:[#allocation4 + $0x20] sm:$0xff]   ;;  %v1716_v20 = vld [vmem:[#allocation4 + $0x68] sm:$0xff]   ;;  %s344_s27 = scalar_lea.vmem %s2232_s7, %s1374_s18 }
  0x85   : > { %1469 = vmatpush3.bf16.msra.mxu0 %v1701_v5  ;;  %v1710_v14 = vld [vmem:[#allocation4 + $0xd8] sm:$0xff]   ;;  %v1714_v18 = vld [vmem:[#allocation4 + $0xe0] sm:$0xff]   ;;  %v1717_v21 = vld [vmem:[#allocation4 + $0x28] sm:$0xff]  }
  0x86   : > { %1470 = vmatprep.subr.bf16.mxu0 %v1704_v8  ;;  %v1711_v15 = vld [vmem:[#allocation4 + $0x98] sm:$0xff]   ;;  %v1715_v19 = vld [vmem:[#allocation4 + $0xa0] sm:$0xff]   ;;  %v1718_v22 = vld [vmem:[#allocation4 + $0xe8] sm:$0xff]  }
  0x87   : > { %1497 = vmatpush3.bf16.msra.mxu1 %v1703_v7  ;;  %v1719_v23 = vld [vmem:[#allocation4 + $0xa8] sm:$0xff]   ;;  %v1720_v24 = vld [vmem:[#allocation4 + $0x70] sm:$0xff]   ;;  %v1724_v28 = vld [vmem:[#allocation4 + $0x78] sm:$0xff]  }
  0x88   : > { %1498 = vmatprep.subr.bf16.mxu1 %v1706_v10  ;;  %v1721_v25 = vld [vmem:[#allocation4 + $0x30] sm:$0xff]   ;;  %v1725_v29 = vld [vmem:[#allocation4 + $0x38] sm:$0xff]   ;;  %v348_v31 = vld [vmem:[%s2156_s15 + $0x8] sm:$0xff] }
  0x89   : > { %1471 = vmatpush3.bf16.msra.mxu0 %v1705_v9  ;;  %v1722_v26 = vld [vmem:[#allocation4 + $0xf0] sm:$0xff]   ;;  %v1726_v30 = vld [vmem:[#allocation4 + $0xf8] sm:$0xff]   ;;  %v355_v32 = vld [vmem:[%s2156_s15 + $0x40] sm:$0xff] }
  0x8a   : > { %1472 = vmatprep.subr.bf16.mxu0 %v1708_v12  ;;  %v1723_v27 = vld [vmem:[#allocation4 + $0xb0] sm:$0xff]   ;;  %v376_v33 = vpack.c.bf16 %v355_v32, %v348_v31  ;;  %v1727_v34 = vld [vmem:[#allocation4 + $0xb8] sm:$0xff]   ;;  %v347_v35 = vld [vmem:[%s2156_s15] sm:$0xff] }
  0x8b   : > { %1499 = vmatpush3.bf16.msra.mxu1 %v1707_v11  ;;  %v354_v36 = vld [vmem:[%s2156_s15 + $0x38] sm:$0xff]  ;;  %v1728_v38 = vld [vmem:[#allocation4 + $0x140] sm:$0xff]   ;;  %v357_v40 = vld [vmem:[%s2156_s15 + $0x50] sm:$0xff] }
  0x8c   : > { %1500 = vmatprep.subr.bf16.mxu1 %v1710_v14  ;;  %827 = vmatprep.mubr.bf16.mxu0 %v376_v33  ;;  %v375_v37 = vpack.c.bf16 %v354_v36, %v347_v35  ;;  %v350_v39 = vld [vmem:[%s2156_s15 + $0x18] sm:$0xff]  ;;  %v1729_v42 = vld [vmem:[#allocation4 + $0x100] sm:$0xff]   ;;  %v349_v43 = vld [vmem:[%s2156_s15 + $0x10] sm:$0xff] }
  0x8d   : > { %1473 = vmatpush3.bf16.msra.mxu0 %v1709_v13  ;;  %v378_v41 = vpack.c.bf16 %v357_v40, %v350_v39  ;;  %v356_v44 = vld [vmem:[%s2156_s15 + $0x48] sm:$0xff]  ;;  %v1732_v48 = vld [vmem:[#allocation4 + $0x150] sm:$0xff]   ;;  %v1734_v50 = vld [vmem:[#allocation4 + $0x158] sm:$0xff]  }
  0x8e   : > { %1474 = vmatprep.subr.bf16.mxu0 %v1712_v16  ;;  %v377_v45 = vpack.c.bf16 %v356_v44, %v349_v43  ;;  %v1730_v46 = vld [vmem:[#allocation4 + $0x148] sm:$0xff]   ;;  %v1733_v49 = vld [vmem:[#allocation4 + $0x110] sm:$0xff]   ;;  %v1735_v51 = vld [vmem:[#allocation4 + $0x118] sm:$0xff]  }
  0x8f   : > { %1501 = vmatpush3.bf16.msra.mxu1 %v1711_v15  ;;  %876 = vmatprep.mubr.bf16.mxu1 %v378_v41  ;;  %v1731_v47 = vld [vmem:[#allocation4 + $0x108] sm:$0xff]   ;;  %v362_v52 = vld [vmem:[%s2156_s15 + $0x78] sm:$0xff]  ;;  %v369_v53 = vld [vmem:[%s2156_s15 + $0xb0] sm:$0xff] }
  0x90   : > { %1502 = vmatprep.subr.bf16.mxu1 %v1714_v18  ;;  %v1736_v54 = vld [vmem:[#allocation4 + $0x160] sm:$0xff]   ;;  %v383_v55 = vpack.c.bf16 %v369_v53, %v362_v52  ;;  %v361_v56 = vld [vmem:[%s2156_s15 + $0x70] sm:$0xff]  ;;  %v368_v57 = vld [vmem:[%s2156_s15 + $0xa8] sm:$0xff] }
  0x91   : > { %1475 = vmatpush3.bf16.msra.mxu0 %v1713_v17  ;;  %v1737_v58 = vld [vmem:[#allocation4 + $0x120] sm:$0xff]   ;;  %v382_v59 = vpack.c.bf16 %v368_v57, %v361_v56  ;;  %v364_v60 = vld [vmem:[%s2156_s15 + $0x88] sm:$0xff]  ;;  %v370_v0 = vld [vmem:[%s2156_s15 + $0xb8] sm:$0xff] }
  0x92   : > { %1476 = vmatprep.subr.bf16.mxu0 %v1716_v20  ;;  %v371_v61 = vld [vmem:[%s2156_s15 + $0xc0] sm:$0xff]  ;;  %v1738_v1 = vld [vmem:[#allocation4 + $0x168] sm:$0xff]   ;;  %v1740_v5 = vld [vmem:[#allocation4 + $0x170] sm:$0xff]  }
  0x93   : > { %1503 = vmatpush3.bf16.msra.mxu1 %v1715_v19  ;;  %v363_v62 = vld [vmem:[%s2156_s15 + $0x80] sm:$0xff]  ;;  %v385_v63 = vpack.c.bf16 %v371_v61, %v364_v60  ;;  %v1739_v4 = vld [vmem:[#allocation4 + $0x128] sm:$0xff]   ;;  %v353_v9 = vld [vmem:[%s2156_s15 + $0x30] sm:$0xff] }
  0x94   : > { %1504 = vmatprep.subr.bf16.mxu1 %v1718_v22  ;;  %v384_v2 = vpack.c.bf16 %v370_v0, %v363_v62  ;;  %v1742_v3 = vld [vmem:[#allocation4 + $0x180] sm:$0xff]   ;;  %v352_v6 = vld [vmem:[%s2156_s15 + $0x28] sm:$0xff]  ;;  %v374_v12 = vld [vmem:[%s2156_s15 + $0xd8] sm:$0xff] }
  0x95   : > { %1477 = vmatpush3.bf16.msra.mxu0 %v1717_v21  ;;  %v359_v7 = vld [vmem:[%s2156_s15 + $0x60] sm:$0xff]  ;;  %v360_v10 = vld [vmem:[%s2156_s15 + $0x68] sm:$0xff]  ;;  %v1741_v13 = vld [vmem:[#allocation4 + $0x130] sm:$0xff]  }
  0x96   : > { %1478 = vmatprep.subr.bf16.mxu0 %v1720_v24  ;;  %v380_v8 = vpack.c.bf16 %v359_v7, %v352_v6  ;;  %v367_v11 = vld [vmem:[%s2156_s15 + $0xa0] sm:$0xff]  ;;  %v381_v14 = vpack.c.bf16 %v360_v10, %v353_v9  ;;  %v1743_v16 = vld [vmem:[#allocation4 + $0x178] sm:$0xff]   ;;  %v373_v21 = vld [vmem:[%s2156_s15 + $0xd0] sm:$0xff] }
  0x97   : > { %1505 = vmatpush3.bf16.msra.mxu1 %v1719_v23  ;;  %v388_v15 = vpack.c.bf16 %v374_v12, %v367_v11  ;;  %v1744_v17 = vld [vmem:[#allocation4 + $0x138] sm:$0xff]   ;;  %v351_v18 = vld [vmem:[%s2156_s15 + $0x20] sm:$0xff]  ;;  %v365_v24 = vld [vmem:[%s2156_s15 + $0x90] sm:$0xff] }
  0x98   : > { %1506 = vmatprep.subr.bf16.mxu1 %v1722_v26  ;;  %v358_v19 = vld [vmem:[%s2156_s15 + $0x58] sm:$0xff]  ;;  %v1749_v31 = vld [vmem:[#allocation6 + $0x20] sm:$0xff]   ;;  %v1750_v32 = vld [vmem:[#allocation6 + $0x28] sm:$0xff]  }
  0x99   : > { %1479 = vmatpush3.bf16.msra.mxu0 %v1721_v25  ;;  %v366_v20 = vld [vmem:[%s2156_s15 + $0x98] sm:$0xff]  ;;  %v379_v22 = vpack.c.bf16 %v358_v19, %v351_v18  ;;  %v372_v25 = vld [vmem:[%s2156_s15 + $0xc8] sm:$0xff]  ;;  %v1754_v36 = vld [vmem:[#allocation7 + $0x8] sm:$0xff]  }
  0x9a   : > { %1480 = vmatprep.subr.bf16.mxu0 %v1724_v28  ;;  %v387_v23 = vpack.c.bf16 %v373_v21, %v366_v20  ;;  %v386_v26 = vpack.c.bf16 %v372_v25, %v365_v24  ;;  %v1746_v28 = vld [vmem:[#allocation6 + $0x8] sm:$0xff]   ;;  %v1751_v33 = vld [vmem:[#allocation6 + $0x30] sm:$0xff]   ;;  %v1753_v35 = vld [vmem:[#allocation7] sm:$0xff]  }
  0x9b   : > { %1507 = vmatpush3.bf16.msra.mxu1 %v1723_v27  ;;  %v1745_v27 = vld [vmem:[#allocation6] sm:$0xff]   ;;  %v1758_v40 = vld [vmem:[#allocation7 + $0x28] sm:$0xff]  }
  0x9c   : > { %1508 = vmatprep.subr.bf16.mxu1 %v1726_v30  ;;  %v1748_v30 = vld [vmem:[#allocation6 + $0x18] sm:$0xff]   ;;  %v1757_v39 = vld [vmem:[#allocation7 + $0x20] sm:$0xff]  }
  0x9d   : > { %1481 = vmatpush3.bf16.msra.mxu0 %v1725_v29  ;;  %v1747_v29 = vld [vmem:[#allocation6 + $0x10] sm:$0xff]  }
  0x9e   : > { %1522 = vmatprep.subr.bf16.mxu0 %v1728_v38  ;;  %v1756_v38 = vld [vmem:[#allocation7 + $0x18] sm:$0xff]  }
  0x9f   : > { %1509 = vmatpush3.bf16.msra.mxu1 %v1727_v34  ;;  %v1752_v34 = vld [vmem:[#allocation6 + $0x38] sm:$0xff]  }
  0xa0   : > { %828 = vmatmul.mubr.bf16.vlgmr.msra.gmra.mrb[0].mxu0 %v375_v37  ;;  %1573 = vmatprep.subr.bf16.mxu1 %v1742_v3  ;;  %v1755_v37 = vld [vmem:[#allocation7 + $0x10] sm:$0xff]  }
  0xa1   : > { %1523 = vmatpush3.bf16.msra.mxu0 %v1729_v42  ;;  %835 = vmatprep.mubr.bf16.mxu0 %v383_v55  ;;  %v1375_v42 = vld [vmem:[%s2227_s2] ss:$0 sm:$0xff] }
  0xa2   : > { %877 = vmatmul.mubr.bf16.vlgmr.msra.gmra.mrb[0].mxu1 %v377_v45  ;;  %1524 = vmatprep.subr.bf16.mxu0 %v1730_v46 }
  0xa3   : > { %884 = vmatprep.mubr.bf16.mxu1 %v385_v63  ;;  %1574 = vmatpush3.bf16.msra.mxu1 %v1742_v3 }
  0xa4   : > { %1579 = vmatprep.subr.bf16.mxu1 %v1745_v27 }
  0xa5   : > { %1525 = vmatpush3.bf16.msra.mxu0 %v1731_v47 }
  0xa6   : > { %1526 = vmatprep.subr.bf16.mxu0 %v1732_v48 }
  0xa8   : > { %836 = vmatmul.mubr.bf16.gmra.mrb[4].mxu0 %v382_v59 }
  0xa9   : > { %1527 = vmatpush3.bf16.msra.mxu0 %v1733_v49  ;;  %925 = vmatprep.mubr.bf16.mxu0 %v380_v8 }
  0xaa   : > { %1528 = vmatprep.subr.bf16.mxu0 %v1734_v50  ;;  %885 = vmatmul.mubr.bf16.gmra.mrb[4].mxu1 %v384_v2 }
  0xab   : > { %1575 = vmatprep.mubr.msk.bf16.mxu1 %vm788_vm0, %v381_v14 }
  0xad   : > { %1529 = vmatpush3.bf16.msra.mxu0 %v1735_v51 }
  0xae   : > { %1530 = vmatprep.subr.bf16.mxu0 %v1736_v54 }
  0xb1   : > { %1531 = vmatpush3.bf16.msra.mxu0 %v1737_v58 }
  0xb2   : > { %1532 = vmatprep.subr.bf16.mxu0 %v1738_v1  ;;  %1576 = vmatmul.mubr.msk.bf16.vlgmr.msra.gmra.mrb[8].mxu1 %vm788_vm0, %v388_v15 }
  0xb3   : > { %1580 = vmatpush3.bf16.msra.mxu1 %v1745_v27 }
  0xb4   : > { %1581 = vmatprep.subr.bf16.mxu1 %v1746_v28 }
  0xb5   : > { %1533 = vmatpush3.bf16.msra.mxu0 %v1739_v4 }
  0xb6   : > { %1534 = vmatprep.subr.bf16.mxu0 %v1740_v5 }
  0xb7   : > { %1582 = vmatpush3.bf16.msra.mxu1 %v1746_v28 }
  0xb8   : > { %1583 = vmatprep.subr.bf16.mxu1 %v1747_v29 }
  0xb9   : > { %1535 = vmatpush3.bf16.msra.mxu0 %v1741_v13 }
  0xba   : > { %1536 = vmatprep.subr.bf16.mxu0 %v1743_v16 }
  0xbb   : > { %1584 = vmatpush3.bf16.msra.mxu1 %v1747_v29 }
  0xbc   : > { %1585 = vmatprep.subr.bf16.mxu1 %v1748_v30 }
  0xbd   : > { %1537 = vmatpush3.bf16.msra.mxu0 %v1744_v17 }
  0xbe   : > { %1599 = vmatprep.subr.bf16.mxu0 %v1753_v35 }
  0xbf   : > { %1586 = vmatpush3.bf16.msra.mxu1 %v1748_v30 }
  0xc0   : > { %926 = vmatmul.mubr.bf16.vlgmr.msra.gmra.mrb[8].mxu0 %v379_v22  ;;  %1587 = vmatprep.subr.bf16.mxu1 %v1749_v31 }
  0xc1   : > { %933 = vmatprep.mubr.bf16.mxu0 %v387_v23  ;;  %1600 = vmatpush3.bf16.msra.mxu0 %v1753_v35 }
  0xc2   : > { %1601 = vmatprep.subr.bf16.mxu0 %v1754_v36 }
  0xc3   : > { %1588 = vmatpush3.bf16.msra.mxu1 %v1749_v31 }
  0xc4   : > { %1589 = vmatprep.subr.bf16.mxu1 %v1750_v32 }
  0xc5   : > { %1602 = vmatpush3.bf16.msra.mxu0 %v1754_v36 }
  0xc6   : > { %1603 = vmatprep.subr.bf16.mxu0 %v1755_v37 }
  0xc7   : > { %1590 = vmatpush3.bf16.msra.mxu1 %v1750_v32 }
  0xc8   : > { %934 = vmatmul.mubr.bf16.gmra.mrb[12].mxu0 %v386_v26  ;;  %1591 = vmatprep.subr.bf16.mxu1 %v1751_v33 }
  0xc9   : > { %1604 = vmatpush3.bf16.msra.mxu0 %v1755_v37 }
  0xca   : > { %1605 = vmatprep.subr.bf16.mxu0 %v1756_v38 }
  0xcb   : > { %1592 = vmatpush3.bf16.msra.mxu1 %v1751_v33 }
  0xcc   : > { %1593 = vmatprep.subr.bf16.mxu1 %v1752_v34 }
  0xcd   : > { %1606 = vmatpush3.bf16.msra.mxu0 %v1756_v38 }
  0xce   : > { %1607 = vmatprep.subr.bf16.mxu0 %v1757_v39 }
  0xcf   : > { %1594 = vmatpush3.bf16.msra.mxu1 %v1752_v34 }
  0xd1   : > { %1608 = vmatpush3.bf16.msra.mxu0 %v1757_v39 }
  0xd2   : > { %1609 = vmatprep.subr.bf16.mxu0 %v1758_v40 }
  0xd5   : > { %1610 = vmatpush3.bf16.msra.mxu0 %v1758_v40  ;;  %v1759_v40 = vld [vmem:[#allocation7 + $0x30] sm:$0xff]  }
  0xd6   : > { %1611 = vmatprep.subr.bf16.mxu0 %v1759_v40 }
  0xd9   : > { %1612 = vmatpush3.bf16.msra.mxu0 %v1759_v40 }
 0x173   : > { %v1482_v41 = vpop.f32.mrb[0].mxu0 }
 0x174   : > { %v1483_v43 = vpop.f32.mrb[1].mxu0 }
 0x175   : > { %v1484_v44 = vadd.f32 %v1483_v43, %v1482_v41  ;;  %v1485_v45 = vpop.f32.mrb[2].mxu0  ;;  %v1510_v46 = vpop.f32.mrb[0].mxu1  ;;  %v1760_v41 = vld [vmem:[#allocation7 + $0x38] sm:$0xff]  }
 0x176   : > { %v1486_v47 = vpop.f32.mrb[3].mxu0  ;;  %v1511_v50 = vpop.f32.mrb[1].mxu1  ;;  %1613 = vmatprep.subr.bf16.mxu0 %v1760_v41 }
 0x177   : > { %v830_v48 = vadd.f32 %v1484_v44, %v1375_v42  ;;  %v1487_v49 = vadd.f32 %v1486_v47, %v1485_v45  ;;  %v1512_v51 = vadd.f32 %v1511_v50, %v1510_v46  ;;  %v1513_v52 = vpop.f32.mrb[2].mxu1  ;;  %1614 = vmatpush3.bf16.msra.mxu0 %v1760_v41 }
 0x178   : > { %v1514_v54 = vpop.f32.mrb[3].mxu1 }
 0x179   : > { %v833_v53 = vadd.f32 %v1487_v49, %v1375_v42  ;;  %v879_v55 = vadd.f32 %v1512_v51, %v830_v48  ;;  %v1515_v56 = vadd.f32 %v1514_v54, %v1513_v52 }
 0x17b   : > { %v882_v57 = vadd.f32 %v1515_v56, %v833_v53  ;;  %v1488_v58 = vpop.f32.mrb[4].mxu0 }
 0x17c   : > { %v1489_v59 = vpop.f32.mrb[5].mxu0 }
 0x17d   : > { %v1490_v60 = vadd.f32 %v1489_v59, %v1488_v58  ;;  %v1491_v61 = vpop.f32.mrb[6].mxu0  ;;  %v1516_v62 = vpop.f32.mrb[4].mxu1  ;;  %v1436_v58 = vld [vmem:[%s2231_s6] ss:$0 sm:$0xff] }
 0x17e   : > { %v1492_v63 = vpop.f32.mrb[7].mxu0  ;;  %v1517_v0 = vpop.f32.mrb[5].mxu1 }
 0x17f   : > { %v838_v1 = vadd.f32 %v1490_v60, %v1375_v42  ;;  %v1493_v2 = vadd.f32 %v1492_v63, %v1491_v61  ;;  %v1518_v3 = vadd.f32 %v1517_v0, %v1516_v62  ;;  %v1519_v4 = vpop.f32.mrb[6].mxu1 }
 0x180   : > { %v1520_v5 = vpop.f32.mrb[7].mxu1 }
 0x181   : > { %v841_v6 = vadd.f32 %v1493_v2, %v1375_v42  ;;  %v887_v7 = vadd.f32 %v1518_v3, %v838_v1  ;;  %v1521_v8 = vadd.f32 %v1520_v5, %v1519_v4  ;;  %v1427_v42 = vld [vmem:[%s2229_s4] ss:$0 sm:$0xff] }
 0x183   : > { %v890_v9 = vadd.f32 %v1521_v8, %v841_v6 }
 0x185   : > { %v1577_v10 = vpop.f32.mrb[8].mxu1 }
 0x186   : > { %v976_v11 = vpop.f32.mrb[9].mxu1 }
 0x187   : > { %v1578_v12 = vpop.f32.mrb[10].mxu1 }
 0x188   : > { %v979_v13 = vpop.f32.mrb[11].mxu1 }
 0x193   : > { %v1538_v14 = vpop.f32.mrb[8].mxu0 }
 0x194   : > { %v1539_v15 = vpop.f32.mrb[9].mxu0 }
 0x195   : > { %v1540_v16 = vadd.f32 %v1539_v15, %v1538_v14  ;;  %v1541_v17 = vpop.f32.mrb[10].mxu0 }
 0x196   : > { %v1542_v18 = vpop.f32.mrb[11].mxu0 }
 0x197   : > { %v1543_v19 = vadd.f32 %v1542_v18, %v1541_v17  ;;  %v928_v20 = vadd.f32 %v1540_v16, %v879_v55 }
 0x199   : > { %v977_v21 = vadd.f32 %v976_v11, %v928_v20  ;;  %v931_v22 = vadd.f32 %v1543_v19, %v882_v57 }
 0x19b   : > { %v980_v23 = vadd.f32 %v979_v13, %v931_v22  ;;  %v1544_v24 = vpop.f32.mrb[12].mxu0  ;;  %v991_v26 = vmax.f32 %v977_v21, 0.0 }
 0x19c   : > { %v1545_v25 = vpop.f32.mrb[13].mxu0 }
 0x19d   : > { %v992_v27 = vmax.f32 %v980_v23, 0.0  ;;  %v1546_v28 = vadd.f32 %v1545_v25, %v1544_v24  ;;  %v1547_v29 = vpop.f32.mrb[14].mxu0 }
 0x19e   : > { %v1548_v30 = vpop.f32.mrb[15].mxu0 }
 0x19f   : > { %v995_v31 = vpack.c.bf16 %v992_v27, %v991_v26  ;;  %v936_v32 = vadd.f32 %v1546_v28, %v887_v7  ;;  %v1549_v33 = vadd.f32 %v1548_v30, %v1547_v29 }
 0x1a1   : > { %v985_v34 = vadd.f32 %v1577_v10, %v936_v32  ;;  %v939_v35 = vadd.f32 %v1549_v33, %v890_v9  ;;  %1595 = vmatprep.mubr.bf16.mxu1 %v995_v31 }
 0x1a3   : > { %v988_v36 = vadd.f32 %v1578_v12, %v939_v35  ;;  %v993_v37 = vmax.f32 %v985_v34, 0.0 }
 0x1a5   : > { %v994_v38 = vmax.f32 %v988_v36, 0.0 }
 0x1a7   : > { %v996_v39 = vpack.c.bf16 %v994_v38, %v993_v37 }
 0x1a9   : > { %1596 = vmatmul.mubr.bf16.vlgmr.msra.gmra.mrb[12].mxu1 %v996_v39 }
 0x27c   : > { %v1597_v43 = vpop.f32.mrb[12].mxu1 }
 0x27d   : > { %v1111_v44 = vadd.f32 %v1597_v43, %v1427_v42  ;;  %v1102_v45 = vpop.f32.mrb[13].mxu1 }
 0x27e   : > { %v1103_v46 = vadd.f32 %v1427_v42, %v1102_v45  ;;  %v1598_v47 = vpop.f32.mrb[14].mxu1 }
 0x27f   : > { %v1114_v48 = vadd.f32 %v1598_v47, %v1427_v42  ;;  %v1105_v49 = vpop.f32.mrb[15].mxu1  ;;  %v1119_v51 = vmax.f32 %v1111_v44, 0.0 }
 0x280   : > { %v1106_v50 = vadd.f32 %v1427_v42, %v1105_v49  ;;  %v1117_v53 = vmax.f32 %v1103_v46, 0.0 }
 0x281   : > { %v1120_v52 = vmax.f32 %v1114_v48, 0.0 }
 0x282   : > { %v1118_v54 = vmax.f32 %v1106_v50, 0.0 }
 0x283   : > { %v1122_v55 = vpack.c.bf16 %v1120_v52, %v1119_v51 }
 0x284   : > { %v1121_v56 = vpack.c.bf16 %v1118_v54, %v1117_v53 }
 0x286   : > { %1615 = vmatprep.mubr.bf16.mxu0 %v1121_v56 }
 0x287   : > { %1616 = vmatmul.mubr.bf16.vlgmr.msra.gmra.mrb[16].mxu0 %v1122_v55 }
 0x35a   : > { %v1617_v57 = vpop.f32.mrb[16].mxu0 }
 0x35b   : > { %v1228_v59 = vpop.f32.mrb[17].mxu0  ;;  %v1237_v61 = vadd.f32 %v1617_v57, %v1436_v58 }
 0x35c   : > { %v1618_v60 = vpop.f32.mrb[18].mxu0  ;;  %v1229_v0 = vadd.f32 %v1436_v58, %v1228_v59 }
 0x35d   : > { %v1240_v62 = vadd.f32 %v1618_v60, %v1436_v58  ;;  %v1231_v63 = vpop.f32.mrb[19].mxu0 }
 0x35e   : > { %v1232_v1 = vadd.f32 %v1436_v58, %v1231_v63 }
 0x35f   : > { %v1463_v2 = vpack.c.bf16 %v1240_v62, %v1237_v61 }
 0x360   : > { %v1458_v3 = vpack.c.bf16 %v1232_v1, %v1229_v0 }
 0x361   : > { %1465 = vst [vmem:[%s344_s27 + $0x8] sm:$0xff] %v1463_v2  }
 0x362   : > { %1459 = vst [vmem:[%s344_s27] sm:$0xff] %v1458_v3  }
 0x363 PF: > { %p19_p11 = scmp.ge.s32.totalorder %s2100_s21, 4   ;;  %s2246_s24 = smov %s1909_s25 }
 0x364   : > { %s2247_s25 = smov %s1913_s26  ;;  %s2248_s26 = smov %s2110_s17 }
 0x365   : > { %s2249_s27 = smov %s2100_s21  ;;  %21 = sbr.rel (!%p19_p11) target bundleno = 5 (0x5), region = 100 }
 0x36c   :  { %1285 = vsyncpa [#allocation3], 1 }
 0x36d   :  { %1287 = vsyncpa [#allocation3 + $0x1], 1 }
 0x36e   :  { %1288 = vsyncpa [#allocation5], 1 }
 0x36f   :  { %1289 = vsyncpa [#allocation8], 1 }

</bundles_post_ra>
